<compile_context>
chip_gen: v7x
topology: tpu7x:2x2x1
jax: 0.10.0
libtpu: 0.0.40
codegen_flags: <defaults>
</compile_context>

<pallas_src>
import math
import functools

import jax
import jax.numpy as jnp
from jax import lax
from jax.experimental import pallas as pl
from jax.experimental.pallas import tpu as pltpu


_VMEM_LIMIT_BYTES = 48 * 1024 * 1024   # explicit, with headroom on v7x (64 MiB)


# ---------------------------------------------------------------------------
# Tiling helpers
# ---------------------------------------------------------------------------
def _pick_tile(dim, desired, align):
    """Largest legal tile <= desired.

    Full dim if it already fits; otherwise the largest divisor of `dim` that is
    a multiple of `align` (8 for sublane dims, 128 for lane dims); final
    fallback is the full dim (block == array extent is always legal).
    """
    if dim <= desired:
        return dim
    top = (desired // align) * align
    for t in range(top, 0, -align):
        if dim % t == 0:
            return t
    return dim


def _head_group(h, d_k, d_model, lane_target=128):
    """#heads per grid step so the lane width (g*d_k) is MXU/store friendly."""
    g = max(1, min(h, lane_target // max(d_k, 1)))
    while h % g != 0:
        g -= 1
    lane = g * d_k
    if lane % 128 != 0 and lane != d_model:
        g = h                      # full-width head block is always legal
    return g


# ---------------------------------------------------------------------------
# Tiled  y = x @ W + b  kernel (fused QKV projection and output projection)
# ---------------------------------------------------------------------------
def _matmul_bias_kernel(x_ref, w_ref, b_ref, o_ref, acc_ref, *, k_axis):
    @pl.when(pl.program_id(k_axis) == 0)
    def _init():
        acc_ref[...] = jnp.zeros_like(acc_ref)

    acc_ref[...] += jnp.dot(x_ref[...], w_ref[...],
                            preferred_element_type=jnp.float32)

    @pl.when(pl.program_id(k_axis) == pl.num_programs(k_axis) - 1)
    def _finalize():
        o_ref[...] = (acc_ref[...] + b_ref[...]).astype(o_ref.dtype)


def linear(x, w_t, b_row, *, out_dtype, tm=512, tn=512, tk=512):
    """torch nn.Linear forward; w_t is pre-transposed (d_in, d_out), bf16."""
    n, d_in = x.shape
    d_out = w_t.shape[1]
    tm = _pick_tile(n, tm, 8)
    tn = _pick_tile(d_out, tn, 128)
    tk = _pick_tile(d_in, tk, 128)
    grid = (n // tm, d_out // tn, d_in // tk)
    return pl.pallas_call(
        functools.partial(_matmul_bias_kernel, k_axis=2),
        grid=grid,
        out_shape=jax.ShapeDtypeStruct((n, d_out), out_dtype),
        in_specs=[
            pl.BlockSpec((tm, tk), lambda i, j, k: (i, k)),
            pl.BlockSpec((tk, tn), lambda i, j, k: (k, j)),
            pl.BlockSpec((1, tn), lambda i, j, k: (0, j)),
        ],
        out_specs=pl.BlockSpec((tm, tn), lambda i, j, k: (i, j)),
        scratch_shapes=[pltpu.VMEM((tm, tn), jnp.float32)],
        compiler_params=pltpu.CompilerParams(
            dimension_semantics=("parallel", "parallel", "arbitrary"),
            vmem_limit_bytes=_VMEM_LIMIT_BYTES),
    )(x, w_t, b_row)


def qkv_projection(x, w3_t, b3, *, tm=512, tn=512, tk=512):
    """Fused self-attention Q/K/V projection over stacked (3, d_in, d_out)
    bf16 weights; output is (3, N, d_out) bf16 (no reshapes afterwards)."""
    n, d_in = x.shape
    d_out = w3_t.shape[2]
    tm = _pick_tile(n, tm, 8)
    tn = _pick_tile(d_out, tn, 128)
    tk = _pick_tile(d_in, tk, 128)
    grid = (3, n // tm, d_out // tn, d_in // tk)
    return pl.pallas_call(
        functools.partial(_matmul_bias_kernel, k_axis=3),
        grid=grid,
        out_shape=jax.ShapeDtypeStruct((3, n, d_out), jnp.bfloat16),
        in_specs=[
            pl.BlockSpec((tm, tk), lambda p, i, j, k: (i, k)),
            pl.BlockSpec((None, tk, tn), lambda p, i, j, k: (p, k, j)),
            pl.BlockSpec((None, 1, tn), lambda p, i, j, k: (p, 0, j)),
        ],
        out_specs=pl.BlockSpec((None, tm, tn), lambda p, i, j, k: (p, i, j)),
        scratch_shapes=[pltpu.VMEM((tm, tn), jnp.float32)],
        compiler_params=pltpu.CompilerParams(
            dimension_semantics=("parallel", "parallel", "parallel",
                                 "arbitrary"),
            vmem_limit_bytes=_VMEM_LIMIT_BYTES),
    )(x, w3_t, b3)


# ---------------------------------------------------------------------------
# Flash attention (online softmax over a KV grid axis) + optional probs pass
# ---------------------------------------------------------------------------
def _qkv_specs(stacked, tq, tkv, lane):
    """BlockSpecs for q/k/v: either a stacked (3, N, d_model) array (self-attn)
    or three separate (N, d_model) arrays (cross-attn)."""
    if stacked:
        q_spec = pl.BlockSpec((None, tq, lane), lambda g, qi, ki: (0, qi, g))
        k_spec = pl.BlockSpec((None, tkv, lane), lambda g, qi, ki: (1, ki, g))
        v_spec = pl.BlockSpec((None, tkv, lane), lambda g, qi, ki: (2, ki, g))
    else:
        q_spec = pl.BlockSpec((tq, lane), lambda g, qi, ki: (qi, g))
        k_spec = pl.BlockSpec((tkv, lane), lambda g, qi, ki: (ki, g))
        v_spec = pl.BlockSpec((tkv, lane), lambda g, qi, ki: (ki, g))
    return q_spec, k_spec, v_spec


def _flash_attn_kernel(q_ref, k_ref, v_ref, o_ref, *rest,
                       g_heads, d_k, emit_lse):
    if emit_lse:
        lse_ref, m_sc, l_sc, acc_sc = rest
    else:
        lse_ref = None
        m_sc, l_sc, acc_sc = rest

    ki = pl.program_id(2)

    @pl.when(ki == 0)
    def _init():
        m_sc[...] = jnp.full_like(m_sc, -jnp.inf)
        l_sc[...] = jnp.zeros_like(l_sc)
        acc_sc[...] = jnp.zeros_like(acc_sc)

    # Static, small per-head loop within the lane-packed head group.
    for gh in range(g_heads):
        lo = gh * d_k
        q = q_ref[:, lo:lo + d_k]            # bf16; 1/sqrt(d_k) folded into Wq
        k = k_ref[:, lo:lo + d_k]
        v = v_ref[:, lo:lo + d_k]
        s = lax.dot_general(q, k, (((1,), (1,)), ((), ())),
                            preferred_element_type=jnp.float32)   # (tq, tkv)
        m_prev = m_sc[gh]
        m_new = jnp.maximum(m_prev, jnp.max(s, axis=-1, keepdims=True))
        alpha = jnp.exp(m_prev - m_new)
        p = jnp.exp(s - m_new)
        l_sc[gh] = alpha * l_sc[gh] + jnp.sum(p, axis=-1, keepdims=True)
        acc_sc[gh] = alpha * acc_sc[gh] + jnp.dot(
            p.astype(v.dtype), v, preferred_element_type=jnp.float32)
        m_sc[gh] = m_new

    @pl.when(ki == pl.num_programs(2) - 1)
    def _finalize():
        outs = []
        for gh in range(g_heads):
            l = l_sc[gh]
            # EUP approximate reciprocal + one Newton step (full f32 accuracy)
            r = pl.reciprocal(l, approx=True)
            r = r * (2.0 - l * r)
            outs.append(acc_sc[gh] * r)
        # One lane-dense (tq, g_heads*d_k) store; no per-head partial stores.
        o_ref[...] = jnp.concatenate(outs, axis=-1).astype(o_ref.dtype)
        if emit_lse:
            lse_ref[...] = m_sc[...] + jnp.log(l_sc[...])


def _attn_probs_kernel(q_ref, k_ref, lse_ref, p_ref, *, g_heads, d_k):
    # Recompute scores and normalize with the per-row logsumexp from the flash
    # pass: p = exp(s - lse)  (exact softmax probabilities, written in bf16).
    for gh in range(g_heads):
        lo = gh * d_k
        s = lax.dot_general(q_ref[:, lo:lo + d_k], k_ref[:, lo:lo + d_k],
                            (((1,), (1,)), ((), ())),
                            preferred_element_type=jnp.float32)
        p_ref[gh] = jnp.exp(s - lse_ref[gh]).astype(p_ref.dtype)


def flash_attention(attn_inputs, h, d_k, d_model, n_q, n_kv, *,
                    return_attn=True, tq=256, tkv=256):
    """attn_inputs: (qkv3,) with qkv3 (3, N, d_model) bf16   (self-attention)
                    or (q, k, v) each (N, d_model) bf16      (cross-attention).
    Returns (out (n_q, d_model) bf16, probs (h, n_q, n_kv) bf16 or None)."""
    g_heads = _head_group(h, d_k, d_model)
    num_groups = h // g_heads
    lane = g_heads * d_k

    tq = _pick_tile(n_q, tq, 8)
    tkv = _pick_tile(n_kv, tkv, 128)
    # v7x megacore: expose >= 2 parallel grid steps whenever possible.
    if num_groups * (n_q // tq) < 2:
        half = tq // 2
        if half >= 8 and half % 8 == 0 and n_q % half == 0:
            tq = half

    grid = (num_groups, n_q // tq, n_kv // tkv)
    stacked = len(attn_inputs) == 1
    inputs = (attn_inputs[0],) * 3 if stacked else tuple(attn_inputs)
    q_spec, k_spec, v_spec = _qkv_specs(stacked, tq, tkv, lane)
    o_spec = pl.BlockSpec((tq, lane), lambda g, qi, ki: (qi, g))
    o_shape = jax.ShapeDtypeStruct((n_q, d_model), jnp.bfloat16)
    scratch = [pltpu.VMEM((g_heads, tq, 1), jnp.float32),    # running max m
               pltpu.VMEM((g_heads, tq, 1), jnp.float32),    # running sum l
               pltpu.VMEM((g_heads, tq, d_k), jnp.float32)]  # output accumulator
    cparams = pltpu.CompilerParams(
        dimension_semantics=("parallel", "parallel", "arbitrary"),
        vmem_limit_bytes=_VMEM_LIMIT_BYTES)
    cost = pl.CostEstimate(
        flops=4 * h * n_q * n_kv * d_k,
        transcendentals=h * n_q * n_kv,
        bytes_accessed=2 * d_model * (2 * n_q + 2 * n_kv))
    kern = functools.partial(_flash_attn_kernel, g_heads=g_heads, d_k=d_k,
                             emit_lse=return_attn)

    if not return_attn:
        out = pl.pallas_call(
            kern, grid=grid, out_shape=o_shape,
            in_specs=[q_spec, k_spec, v_spec], out_specs=o_spec,
            scratch_shapes=scratch, compiler_params=cparams,
            cost_estimate=cost)(*inputs)
        return out, None

    # Flash pass also emits the per-row/per-head logsumexp (tiny, f32).
    lse_shape = jax.ShapeDtypeStruct((num_groups, g_heads, n_q, 1), jnp.float32)
    lse_spec = pl.BlockSpec((None, g_heads, tq, 1),
                            lambda g, qi, ki: (g, 0, qi, 0))
    out, lse = pl.pallas_call(
        kern, grid=grid, out_shape=(o_shape, lse_shape),
        in_specs=[q_spec, k_spec, v_spec], out_specs=(o_spec, lse_spec),
        scratch_shapes=scratch, compiler_params=cparams,
        cost_estimate=cost)(*inputs)

    # Second, all-parallel, KV-tiled pass writes the normalized probabilities.
    probs = pl.pallas_call(
        functools.partial(_attn_probs_kernel, g_heads=g_heads, d_k=d_k),
        grid=grid,
        out_shape=jax.ShapeDtypeStruct((h, n_q, n_kv), jnp.bfloat16),
        in_specs=[q_spec, k_spec, lse_spec],
        out_specs=pl.BlockSpec((g_heads, tq, tkv),
                               lambda g, qi, ki: (g, qi, ki)),
        compiler_params=pltpu.CompilerParams(
            dimension_semantics=("parallel", "parallel", "parallel"),
            vmem_limit_bytes=_VMEM_LIMIT_BYTES),
    )(inputs[0], inputs[1], lse)
    return out, probs


# ---------------------------------------------------------------------------
# Module wrapper
# ---------------------------------------------------------------------------
def init_multi_head_attention(rng, h, d_model):
    assert d_model % h == 0
    d_k = d_model // h
    keys = jax.random.split(rng, 8)
    bound = 1.0 / math.sqrt(d_model)

    def w(k):  # torch nn.Linear layout: (out_features, in_features)
        return jax.random.uniform(k, (d_model, d_model), jnp.float32,
                                  minval=-bound, maxval=bound)

    def b(k):
        return jax.random.uniform(k, (d_model,), jnp.float32,
                                  minval=-bound, maxval=bound)

    wq, bq = w(keys[0]), b(keys[1])
    wk, bk = w(keys[2]), b(keys[3])
    wv, bv = w(keys[4]), b(keys[5])
    wo, bo = w(keys[6]), b(keys[7])

    scale = 1.0 / math.sqrt(d_k)           # fold 1/sqrt(d_k) into Q projection
    wq_s, bq_s = wq * scale, bq * scale

    return {
        "h": h, "d_model": d_model,
        # f32 torch-layout originals (used only by the pure-JAX reference)
        "wq": wq, "bq": bq, "wk": wk, "bk": bk, "wv": wv, "bv": bv,
        "wo": wo, "bo_vec": bo,
        # kernel-side layouts: bf16 pre-transposed weights, f32 biases
        "w_qkv_t": jnp.stack([wq_s.T, wk.T, wv.T], 0).astype(jnp.bfloat16),
        "b_qkv": jnp.stack([bq_s, bk, bv], 0)[:, None, :],       # (3,1,d) f32
        "wq_t": wq_s.T.astype(jnp.bfloat16),
        "wk_t": wk.T.astype(jnp.bfloat16),
        "wv_t": wv.T.astype(jnp.bfloat16),
        "wo_t": wo.T.astype(jnp.bfloat16),
        "bq_row": bq_s[None, :], "bk_row": bk[None, :],
        "bv_row": bv[None, :], "bo_row": bo[None, :],
        # declared by the torch module but never used in forward
        "a": jnp.ones((1,), jnp.float32),
        "b": jnp.ones((1,), jnp.float32),
    }


def multi_head_attention_forward(params, query, key, value, mask=None,
                                 return_attn=True):
    """query/key/value: (B, S, d_model) ->
       (x (B*S, d_model) f32, attn (h, B*S, B*S) bf16 or None)."""
    if mask is not None:
        # TODO(synk): legacy 4-D-broadcast mask path of the torch module is
        # shape-inconsistent with the flattened 3-D scores; not implemented.
        raise NotImplementedError("mask is not supported")

    h, d_model = params["h"], params["d_model"]
    d_k = d_model // h

    qf = query.reshape(-1, d_model).astype(jnp.bfloat16)
    shared = (query is key) and (key is value)
    if shared:
        qkv3 = qkv_projection(qf, params["w_qkv_t"], params["b_qkv"])
        attn_inputs = (qkv3,)
        n_q = n_kv = qf.shape[0]
    else:
        kf = key.reshape(-1, d_model).astype(jnp.bfloat16)
        vf = value.reshape(-1, d_model).astype(jnp.bfloat16)
        assert kf.shape[0] == vf.shape[0]
        # Three separate projections avoid the jnp.stack([q,k,v]) HBM round trip.
        q2 = linear(qf, params["wq_t"], params["bq_row"], out_dtype=jnp.bfloat16)
        k2 = linear(kf, params["wk_t"], params["bk_row"], out_dtype=jnp.bfloat16)
        v2 = linear(vf, params["wv_t"], params["bv_row"], out_dtype=jnp.bfloat16)
        attn_inputs = (q2, k2, v2)
        n_q, n_kv = qf.shape[0], kf.shape[0]

    # TODO(synk): nn.Dropout(p=0.1) on p_attn is identity in eval mode;
    # training dropout (pltpu.prng_*) is not implemented here.
    x, attn = flash_attention(attn_inputs, h, d_k, d_model, n_q, n_kv,
                              return_attn=return_attn)
    # TODO(synk): the Wo projection could be fused into the attention epilogue
    # (head-group axis as a reduction) to save one (N, d_model) HBM round trip.
    x = linear(x, params["wo_t"], params["bo_row"], out_dtype=jnp.float32)
    return x, attn


# ---------------------------------------------------------------------------
# Pure-JAX f32 reference for verification
# ---------------------------------------------------------------------------
def _reference(params, query, key, value):
    h = params["h"]
    d_model = params["d_model"]
    d_k = d_model // h
    qf = query.reshape(-1, d_model)
    kf = key.reshape(-1, d_model)
    vf = value.reshape(-1, d_model)
    n = qf.shape[0]
    q = qf @ params["wq"].T + params["bq"]
    k = kf @ params["wk"].T + params["bk"]
    v = vf @ params["wv"].T + params["bv"]
    qh = q.reshape(n, h, d_k).transpose(1, 0, 2)
    kh = k.reshape(kf.shape[0], h, d_k).transpose(1, 0, 2)
    vh = v.reshape(vf.shape[0], h, d_k).transpose(1, 0, 2)
    scores = jnp.einsum("hnd,hmd->hnm", qh, kh) / math.sqrt(d_k)
    p = jax.nn.softmax(scores, axis=-1)
    x = jnp.einsum("hnm,hmd->hnd", p, vh)
    x = x.transpose(1, 0, 2).reshape(n, d_model)
    x = x @ params["wo"].T + params["bo_vec"]
    return x, p


if __name__ == "__main__":
    B, S, D_MODEL, H = 2, 8, 32, 4

    rng = jax.random.PRNGKey(0)
    r_params, r_x, r_q, r_k, r_v = jax.random.split(rng, 5)
    params = init_multi_head_attention(r_params, H, D_MODEL)

    # --- self-attention path (fused stacked-QKV projection) ----------------
    x_in = jax.random.normal(r_x, (B, S, D_MODEL), jnp.float32)
    out, attn = multi_head_attention_forward(params, x_in, x_in, x_in)
    out = jax.block_until_ready(out)
    attn = jax.block_until_ready(attn)
    assert out.shape == (B * S, D_MODEL)
    assert attn.shape == (H, B * S, B * S)
    ref_out, ref_attn = _reference(params, x_in, x_in, x_in)
    assert jnp.allclose(out, ref_out, rtol=5e-2, atol=5e-2)
    assert jnp.allclose(attn.astype(jnp.float32), ref_attn,
                        rtol=5e-2, atol=2e-2)

    # --- cross-attention path (distinct q/k/v, separate projections) -------
    q_in = jax.random.normal(r_q, (B, S, D_MODEL), jnp.float32)
    k_in = jax.random.normal(r_k, (B, S, D_MODEL), jnp.float32)
    v_in = jax.random.normal(r_v, (B, S, D_MODEL), jnp.float32)
    out2, attn2 = multi_head_attention_forward(params, q_in, k_in, v_in)
    out2 = jax.block_until_ready(out2)
    attn2 = jax.block_until_ready(attn2)
    ref_out2, ref_attn2 = _reference(params, q_in, k_in, v_in)
    assert jnp.allclose(out2, ref_out2, rtol=5e-2, atol=5e-2)
    assert jnp.allclose(attn2.astype(jnp.float32), ref_attn2,
                        rtol=5e-2, atol=2e-2)

    # --- return_attn=False fast path (no (h, N, N) probs written to HBM) ---
    out3, attn3 = multi_head_attention_forward(params, x_in, x_in, x_in,
                                               return_attn=False)
    out3 = jax.block_until_ready(out3)
    assert attn3 is None
    assert jnp.allclose(out3, ref_out, rtol=5e-2, atol=5e-2)

    print("KERNEL_OK")
</pallas_src>

<mosaic_0001>
module attributes {stable_mosaic.version = 11 : i64} {
  func.func @_matmul_bias_kernel(%arg0: i32, %arg1: i32, %arg2: i32, %arg3: i32, %arg4: memref<16x32xbf16, #tpu.memory_space<vmem>>, %arg5: memref<1x32x32xbf16, #tpu.memory_space<vmem>>, %arg6: memref<1x1x32xf32, #tpu.memory_space<vmem>>, %arg7: memref<1x16x32xbf16, #tpu.memory_space<vmem>>, %arg8: memref<16x32xf32, #tpu.memory_space<vmem>>) attributes {dimension_semantics = [#tpu.dimension_semantics<parallel>, #tpu.dimension_semantics<parallel>, #tpu.dimension_semantics<parallel>, #tpu.dimension_semantics<arbitrary>], iteration_bounds = array<i64: 3, 1, 1, 1>, scalar_prefetch = 0 : i64, scratch_operands = 1 : i64, tpu.core_type = #tpu.core_type<tc>, window_params = [{transform_indices = @transform_0, window_bounds = array<i64: 16, 32>}, {transform_indices = @transform_1, window_bounds = array<i64: 1, 32, 32>}, {transform_indices = @transform_2, window_bounds = array<i64: 1, 1, 32>}, {transform_indices = @transform_3, window_bounds = array<i64: 1, 16, 32>}]} {
    %c0_i32 = arith.constant 0 : i32
    %0 = arith.cmpi eq, %arg3, %c0_i32 : i32
    %1 = arith.extui %0 : i1 to i32
    %c0_i32_0 = arith.constant 0 : i32
    %2 = arith.cmpi ne, %1, %c0_i32_0 : i32
    scf.if %2 {
      %cst_11 = arith.constant 0.000000e+00 : f32
      %13 = vector.broadcast %cst_11 : f32 to vector<16x32xf32>
      %c0_12 = arith.constant 0 : index
      %c0_13 = arith.constant 0 : index
      %14 = vector.load %arg8[%c0_12, %c0_13] : memref<16x32xf32, #tpu.memory_space<vmem>>, vector<16x32xf32>
      tpu.vector_store %arg8[%c0_12, %c0_13], %13 {strides = array<i32>} : memref<16x32xf32, #tpu.memory_space<vmem>>, vector<16x32xf32>,
    } else {
    }
    %c0 = arith.constant 0 : index
    %c0_1 = arith.constant 0 : index
    %3 = vector.load %arg8[%c0, %c0_1] : memref<16x32xf32, #tpu.memory_space<vmem>>, vector<16x32xf32>
    %c0_2 = arith.constant 0 : index
    %c0_3 = arith.constant 0 : index
    %4 = vector.load %arg4[%c0_2, %c0_3] : memref<16x32xbf16, #tpu.memory_space<vmem>>, vector<16x32xbf16>
    %c0_4 = arith.constant 0 : index
    %c0_5 = arith.constant 0 : index
    %c0_6 = arith.constant 0 : index
    %5 = vector.load %arg5[%c0_4, %c0_5, %c0_6] : memref<1x32x32xbf16, #tpu.memory_space<vmem>>, vector<1x32x32xbf16>
    %6 = vector.shape_cast %5 : vector<1x32x32xbf16> to vector<32x32xbf16>
    %cst = arith.constant dense<0.000000e+00> : vector<16x32xf32>
    %7 = tpu.matmul %4, %6, %cst {dimension_numbers = #tpu.dot_dimension_numbers<[1], [0], [0], [1], [0, 0, 1, 1], [], []>} : vector<16x32xbf16>, vector<32x32xbf16>, vector<16x32xf32> -> vector<16x32xf32>
    %8 = arith.addf %3, %7 : vector<16x32xf32>
    %c0_7 = arith.constant 0 : index
    %c0_8 = arith.constant 0 : index
    %9 = vector.load %arg8[%c0_7, %c0_8] : memref<16x32xf32, #tpu.memory_space<vmem>>, vector<16x32xf32>
    tpu.vector_store %arg8[%c0_7, %c0_8], %8 {strides = array<i32>} : memref<16x32xf32, #tpu.memory_space<vmem>>, vector<16x32xf32>,
    %c0_i32_9 = arith.constant 0 : i32
    %10 = arith.cmpi eq, %arg3, %c0_i32_9 : i32
    %11 = arith.extui %10 : i1 to i32
    %c0_i32_10 = arith.constant 0 : i32
    %12 = arith.cmpi ne, %11, %c0_i32_10 : i32
    scf.if %12 {
      %c0_11 = arith.constant 0 : index
      %c0_12 = arith.constant 0 : index
      %13 = vector.load %arg8[%c0_11, %c0_12] : memref<16x32xf32, #tpu.memory_space<vmem>>, vector<16x32xf32>
      %c0_13 = arith.constant 0 : index
      %c0_14 = arith.constant 0 : index
      %c0_15 = arith.constant 0 : index
      %14 = vector.load %arg6[%c0_13, %c0_14, %c0_15] : memref<1x1x32xf32, #tpu.memory_space<vmem>>, vector<1x1x32xf32>
      %15 = vector.shape_cast %14 : vector<1x1x32xf32> to vector<1x32xf32>
      %16 = vector.broadcast %15 : vector<1x32xf32> to vector<16x32xf32>
      %17 = arith.addf %13, %16 : vector<16x32xf32>
      %18 = arith.truncf %17 : vector<16x32xf32> to vector<16x32xbf16>
      %c0_16 = arith.constant 0 : index
      %c0_17 = arith.constant 0 : index
      %c0_18 = arith.constant 0 : index
      %19 = vector.load %arg7[%c0_16, %c0_17, %c0_18] : memref<1x16x32xbf16, #tpu.memory_space<vmem>>, vector<1x16x32xbf16>
      %20 = vector.shape_cast %19 : vector<1x16x32xbf16> to vector<16x32xbf16>
      %21 = vector.shape_cast %18 : vector<16x32xbf16> to vector<1x16x32xbf16>
      tpu.vector_store %arg7[%c0_16, %c0_17, %c0_18], %21 {strides = array<i32>} : memref<1x16x32xbf16, #tpu.memory_space<vmem>>, vector<1x16x32xbf16>,
    } else {
    }
    return
  }
  func.func @transform_0(%arg0: i32, %arg1: i32, %arg2: i32, %arg3: i32) -> (i32, i32) {
    %c0_i32 = arith.constant 0 : i32
    return %arg1, %arg3 : i32, i32
  }
  func.func @transform_1(%arg0: i32, %arg1: i32, %arg2: i32, %arg3: i32) -> (i32, i32, i32) {
    %c0_i32 = arith.constant 0 : i32
    return %arg0, %arg3, %arg2 : i32, i32, i32
  }
  func.func @transform_2(%arg0: i32, %arg1: i32, %arg2: i32, %arg3: i32) -> (i32, i32, i32) {
    %c0_i32 = arith.constant 0 : i32
    %c0_i32_0 = arith.constant 0 : i32
    return %arg0, %c0_i32, %arg2 : i32, i32, i32
  }
  func.func @transform_3(%arg0: i32, %arg1: i32, %arg2: i32, %arg3: i32) -> (i32, i32, i32) {
    %c0_i32 = arith.constant 0 : i32
    return %arg0, %arg1, %arg2 : i32, i32, i32
  }
}

</mosaic_0001>

<bundles_post_ra>
// kernel: tpu_custom_call.1
= control target key start
LH: loop header
LB: loop body
LE: loop exit
PB: predicated region body
PF: predicated region fallthrough
CT: control target
= control target key end

     0   :  { %8 = vsyncpa [#allocation4], 0  ;;  %s1057_s0 = inlined_call_operand.hbm [shape: bf16[16,32], index: 0, kind: input, shape index: {}]   ;;  %s1058_s1 = inlined_call_operand.hbm [shape: bf16[3,32,32], index: 1, kind: input, shape index: {}]   ;;  %s1059_s2 = inlined_call_operand.vmem [shape: f32[3,1,32], index: 2, kind: input, shape index: {}]   ;;  %s1060_s3 = inlined_call_operand.hbm [shape: bf16[3,16,32], index: 3, kind: output, shape index: {}]  }
   0x1   :  { %9 = vsyncpa [#allocation7], 0 }
   0x2   :  { %11 = vsyncpa [#allocation7 + $0x1], 0 }
   0x3   :  { %12 = vsyncpa [#allocation5], 0 }
   0x4   :  { %14 = vsyncpa [#allocation5 + $0x1], 0  ;;  %s823_s12 = smov 0   ;;  %s825_s13 = smov 0  }
   0x5   :  { %s827_s14 = smov 0   ;;  %s829_s15 = smov 0  }
   0x6   :  { %s831_s16 = smov 0   ;;  %s833_s17 = smov 0  }
   0x7 LB: > { %s527_s18 = sadd.s32 4294967295, %s792_s17   ;;  %s528_s19 = sadd.s32 4294967294, %s792_s17   ;;  %s792_s17 = sphi %s833_s17, %s20_s17   ;;  %s788_s16 = sphi %s831_s16, %s1083_s16   ;;  %s784_s15 = sphi %s829_s15, %s1082_s15   ;;  %s780_s14 = sphi %s827_s14, %s1081_s14   ;;  %s776_s13 = sphi %s825_s13, %s1080_s13   ;;  %s772_s12 = sphi %s823_s12, %s1079_s12  }
   0x8   : > { %p98_p0 = scmp.ne.s32.totalorder %s776_s13, %s772_s12  ;;  %p857_p1 = scmp.eq.s32.totalorder %s527_s18, 0 }
   0x9   : > { %p861_p2 = scmp.eq.s32.totalorder %s527_s18, 2  ;;  %p160_p3 = scmp.eq.s32.totalorder %s528_s19, 2 }
   0xa   : > { %s1065_s20 = scalar_select %p857_p1, 1, 0 }
   0xb   : > { %s1066_s21 = scalar_select %p861_p2, 1, 0 }
   0xc   : > { %p867_p4 = por %p857_p1, %p98_p0  ;;  %p529_p5 = scmp.ge.s32.totalorder %s792_s17, 1 }
   0xd   : > { %p872_p6 = por %p160_p3, %p98_p0  ;;  %p167_p7 = scmp.lt.s32.totalorder %s792_s17, 4 }
   0xe   : > { %s1067_s22 = scalar_select %p867_p4, 1, 0 }
   0xf   : > { %s1068_s23 = scalar_select %p872_p6, 1, 0 }
  0x10   : > { %p877_p8 = pnand %p529_p5, %p167_p7  ;;  %s794_s25 = smov [#allocation3]  }
  0x11   : > { %s183_s26 = sshll.u32 %s794_s25, 4  ;;  %s46_s28 = sadd.s32 1, %s788_s16  ;;  %s184_s26 = int_to_ptr.vmem [resolvable:$true] %s183_s26 }
  0x12   : > { %s1069_s24 = scalar_select %p877_p8, 1, 0 }
  0x13   : > { %p574_p9 = pneg %p877_p8  ;;  %s648_s4 = scalar_lea.hbm %s1057_s0, 128 }
  0x14   : > { %p649_p11 = scmp.ne.s32.totalorder %s1057_s0, %s648_s4  ;;  %p655_p3 = scmp.lt.u32.totalorder %s648_s4, %s1057_s0 }
  0x15   : > { %p885_p10 = pnand %p574_p9, %p857_p1 }
  0x17   : > { %p650_p12 = pneg %p885_p10 }
  0x19   : > { %p651_p13 = pnand %p650_p12, %p649_p11 }
  0x1b   : > { %p652_p0 = pneg %p651_p13 }
  0x1d   : > { %p657_p5 = pnand %p655_p3, %p652_p0 }
  0x1f   : > { %660 = shalt.err (!%p657_p5)
}
  0x20   : > { %s661_s9 = scalar_lea.vmem %s184_s26, 128  ;;  %p669_p4 = scmp.lt.s32.totalorder %s184_s26, %s184_s26 }
  0x21   : > { %p662_p7 = scmp.ne.s32.totalorder %s184_s26, %s661_s9  ;;  %p670_p1 = scmp.lt.s32.totalorder %s661_s9, %s661_s9 }
  0x23   : > { %p664_p9 = pnand %p662_p7, %p650_p12  ;;  %p671_p8 = por %p670_p1, %p669_p4 }
  0x25   : > { %p665_p6 = pneg %p664_p9 }
  0x27   : > { %p672_p2 = pnand %p671_p8, %p665_p6 }
  0x29   : > { %675 = shalt.err (!%p672_p2)
}
  0x2a   : > { %s795_s10 = smov 64   ;;  %s796_s11 = smov 4  }
  0x2b   : > { %577 = dma.hbm_to_vmem [thread:$0]  (!%p885_p10), %s1057_s0, 128, %s184_s26, [#allocation4], %s795_s10, %s795_s10, %s796_s11  }
  0x2c   : > { %p48_p1 = scmp.ge.s32.totalorder %s46_s28, 3  ;;  %s85_s25 = sadd.s32 1, %s780_s14 }
  0x2d   : > { %p92_p2 = scmp.ne.s32.totalorder %s780_s14, %s776_s13  ;;  %p93_p4 = scmp.eq.s32.totalorder %s792_s17, 0 }
  0x2e   : > { %s1085_s28 = smov (%p48_p1, %s46_s28), 0  ;;  %p1072_p8 = scmp.ne.s32.totalorder %s1066_s21, 0 }
  0x2f   : > { %p915_p6 = por %p93_p4, %p92_p2  ;;  %s78_s30 = ssub.s32 %s788_s16, %s1085_s28 }
  0x30   : > { %p921_p11 = por %p1072_p8, %p92_p2  ;;  %p587_p12 = scmp.lt.s32.totalorder %s792_s17, 3 }
  0x31   : > { %p83_p10 = scmp.eq.s32.totalorder %s78_s30, 0  ;;  %s197_s26 = sand.u32 1, %s780_s14  }
  0x32   : > { %s532_s4 = sshll.u32 %s197_s26, 4  ;;  %s551_s6 = sshll.u32 %s788_s16, 8 }
  0x33   : > { %s930_s5 = scalar_select %p83_p10, %s780_s14, %s85_s25  }
  0x34   : > { %s936_s9 = scalar_lea.hbm %s1058_s1, %s551_s6  ;;  %s201_s21 = scalar_lea.vmem [#allocation6], %s532_s4 }
  0x35   : > { %s211_s18 = sshll.u32 %s201_s21, 4  ;;  %p942_p13 = pnand %p587_p12, %p915_p6  ;;  %s938_s18 = int_to_ptr.vmem [resolvable:$true] %s211_s18 }
  0x36   : > { %s946_s25 = scalar_lea.sflag [#allocation7], %s197_s26  ;;  %s676_s30 = scalar_lea.hbm %s936_s9, 256 }
  0x37   : > { %p677_p0 = scmp.ne.s32.totalorder %s936_s9, %s676_s30  ;;  %p678_p3 = pneg %p942_p13 }
  0x38   : > { %s681_s29 = scalar_lea.hbm %s1058_s1, 768  ;;  %p682_p9 = scmp.lt.u32.totalorder %s936_s9, %s1058_s1 }
  0x39   : > { %p679_p5 = pnand %p678_p3, %p677_p0  ;;  %p683_p1 = scmp.lt.u32.totalorder %s681_s29, %s676_s30 }
  0x3a   : > { %p685_p4 = scmp.lt.u32.totalorder %s676_s30, %s936_s9 }
  0x3b   : > { %p680_p7 = pneg %p679_p5  ;;  %p684_p2 = por %p683_p1, %p682_p9 }
  0x3d   : > { %p686_p6 = por %p685_p4, %p684_p2 }
  0x3f   : > { %p687_p8 = pnand %p686_p6, %p680_p7 }
  0x41   : > { %690 = shalt.err (!%p687_p8)
}
  0x42   : > { %s691_s26 = scalar_lea.vmem %s938_s18, 256  ;;  %s797_s21 = smov [#allocation6]  }
  0x43   : > { %p692_p12 = scmp.ne.s32.totalorder %s938_s18, %s691_s26  ;;  %s696_s4 = sshll.u32 %s797_s21, 4  ;;  %s697_s4 = int_to_ptr.vmem [resolvable:$false] %s696_s4 }
  0x44   : > { %s698_s6 = scalar_lea.vmem %s697_s4, 512  ;;  %p699_p5 = scmp.lt.s32.totalorder %s938_s18, %s697_s4 }
  0x45   : > { %p694_p10 = pnand %p692_p12, %p678_p3  ;;  %p700_p9 = scmp.lt.s32.totalorder %s698_s6, %s691_s26 }
  0x47   : > { %p695_p0 = pneg %p694_p10  ;;  %p701_p1 = por %p700_p9, %p699_p5 }
  0x49   : > { %p702_p2 = pnand %p701_p1, %p695_p0 }
  0x4b   : > { %705 = shalt.err (!%p702_p2)
}
  0x4c   : > { %581 = dma.hbm_to_vmem [thread:$0]  (!%p942_p13), %s936_s9, 256, %s938_s18, %s946_s25, %s795_s10, %s795_s10, %s796_s11  }
  0x4d   : > { %p1075_p3 = scmp.ne.s32.totalorder %s1069_s24, 0 }
  0x4e   : > { %p1076_p7 = scmp.ne.s32.totalorder (!%p1075_p3), %s1065_s20, 0 }
  0x4f   : > { %232 = sbr.rel (%p1075_p3) target bundleno = 343 (0x157), region = 32 }
  0x56   : > { %759 = dma.done.wait (%p1076_p7), [#allocation4], 128  }
  0x57   : > { %761 = vsyncadd (%p1076_p7), [#allocation4], 4294967168  ;;  %s984_s30 = sand.u32 1, %s776_s13   ;;  %p1077_p4 = scmp.ne.s32.totalorder %s1067_s22, 0 }
  0x58   : > { %s537_s19 = sshll.u32 %s984_s30, 4  ;;  %s239_s29 = scalar_lea.sflag [#allocation7], %s984_s30 }
  0x59   : > { %s242_s7 = scalar_lea.vmem [#allocation6], %s537_s19 }
  0x5a   : > { %763 = dma.done.wait (%p1077_p4), %s239_s29, 256  }
  0x5b   : > { %765 = vsyncadd (%p1077_p4), %s239_s29, 4294967040  ;;  %vm285_vm0 = vcmask 261120   ;;  %v798_v0 = vmov 0.0   ;;  %vm799_vm1 = vmmov 0   ;;  %v645_v1 = vld [vmem:[%s242_s7] sm:$0xff]   ;;  %v646_v2 = vld [vmem:[%s242_s7 + $0x8] sm:$0xff]  }
  0x5c   : > { %558 = vmatprep.subr.bf16.mxu0 %v798_v0  ;;  %562 = vmatprep.mubr.msk.bf16.mxu0 %vm799_vm1, %v798_v0  ;;  %286 = vst.msk [vmem:[#allocation2] sm:$0xff] %vm285_vm0, %v798_v0  ;;  %287 = vst.msk [vmem:[#allocation2 + $0x8] sm:$0xff] %vm285_vm0, %v798_v0  ;;  %v647_v3 = vld [vmem:[#allocation3] sm:$0xff]   ;;  %p273_p13 = scmp.lt.s32.totalorder %s784_s15, 2  ;;  %s538_s22 = sshll.u32 %s984_s30, 3  ;;  %vm384_vm2 = vcmask 257024  }
  0x5d   : > { %559 = vmatpush3.bf16.msra.mxu0 %v645_v1  ;;  %s554_s9 = sshll.u32 %s784_s15, 7  ;;  %s270_s18 = scalar_lea.vmem [#allocation8], %s538_s22 }
  0x5e   : > { %560 = vmatprep.subr.bf16.mxu0 %v798_v0  ;;  %s274_s20 = scalar_select %p273_p13, %s784_s15, 2 }
  0x5f   : > { %s404_s25 = sshll.u32 %s270_s18, 4  ;;  %s1007_s21 = scalar_lea.hbm %s1060_s3, %s554_s9  ;;  %s1009_s25 = int_to_ptr.vmem [resolvable:$true] %s404_s25 }
  0x60   : > { %s278_s11 = scalar_lea.vmem %s1059_s2, %s274_s20  ;;  %s388_s15 = scalar_lea.sflag [#allocation5], %s984_s30 }
  0x61   : > { %561 = vmatpush3.bf16.msra.mxu0 %v646_v2  ;;  %v543_v12 = vld [vmem:[%s278_s11] ss:$0 sm:$0xff]  ;;  %s706_s4 = scalar_lea.vmem %s1009_s25, 128  ;;  %s800_s6 = smov [#allocation8]  }
  0x62   : > { %p707_p6 = scmp.ne.s32.totalorder %s1009_s25, %s706_s4  ;;  %s710_s19 = sshll.u32 %s800_s6, 4  ;;  %s711_s19 = int_to_ptr.vmem [resolvable:$false] %s710_s19 }
  0x63   : > { %v288_v4 = vld [vmem:[#allocation2] sm:$0xff]  ;;  %v289_v6 = vld [vmem:[#allocation2 + $0x8] sm:$0xff]  ;;  %s712_s29 = scalar_lea.vmem %s711_s19, 256  ;;  %p713_p10 = scmp.lt.s32.totalorder %s1009_s25, %s711_s19 }
  0x64   : > { %563 = vmatmul.mubr.msk.bf16.vlgmr.msra.gmra.mrb[0].mxu0 %vm285_vm0, %v647_v3  ;;  %p708_p8 = pnand %p707_p6, %p921_p11  ;;  %p714_p0 = scmp.lt.s32.totalorder %s712_s29, %s706_s4 }
  0x66   : > { %p709_p12 = pneg %p708_p8  ;;  %p715_p5 = por %p714_p0, %p713_p10 }
  0x68   : > { %p716_p9 = pnand %p715_p5, %p709_p12 }
 0x137   : > { %v351_v5 = vpop.f32.mrb[0].mxu0 }
 0x138   : > { %v358_v7 = vadd.f32 %v351_v5, %v288_v4  ;;  %v564_v8 = vpop.f32.mrb[1].mxu0 }
 0x139   : > { %v354_v9 = vpop.f32.mrb[2].mxu0 }
 0x13a   : > { %360 = vst.msk [vmem:[#allocation2] sm:$0xff] %vm285_vm0, %v358_v7  ;;  %v359_v10 = vadd.f32 %v354_v9, %v289_v6  ;;  %v565_v11 = vpop.f32.mrb[3].mxu0 }
 0x13c   : > { %361 = vst.msk [vmem:[#allocation2 + $0x8] sm:$0xff] %vm285_vm0, %v359_v10 }
 0x141   : > { %v365_v13 = vld [vmem:[#allocation2] sm:$0xff] }
 0x142   : > { %v374_v14 = vadd.f32 %v543_v12, %v365_v13 }
 0x143   : > { %v366_v15 = vld [vmem:[#allocation2 + $0x8] sm:$0xff] }
 0x144   : > { %v375_v16 = vadd.f32 %v543_v12, %v366_v15  ;;  %v552_v17 = vpack.c.bf16 %v374_v14, %v374_v14 }
 0x146   : > { %v553_v18 = vpack.c.bf16 %v375_v16, %v375_v16  ;;  %385 = vst.msk [vmem:[%s270_s18] sm:$0xf] %vm384_vm2, %v552_v17 }
 0x148   : > { %386 = vst.msk [vmem:[%s270_s18 + $0x4] sm:$0xf] %vm384_vm2, %v553_v18 }
 0x149   : > { %719 = shalt.err (!%p716_p9)
}
 0x14a   : > { %s720_s7 = scalar_lea.hbm %s1007_s21, 128  ;;  %s724_s24 = scalar_lea.hbm %s1060_s3, 384 }
 0x14b   : > { %p721_p1 = scmp.ne.s32.totalorder %s1007_s21, %s720_s7  ;;  %p725_p7 = scmp.lt.u32.totalorder %s1007_s21, %s1060_s3 }
 0x14c   : > { %p726_p4 = scmp.lt.u32.totalorder %s724_s24, %s720_s7  ;;  %p728_p6 = scmp.lt.u32.totalorder %s720_s7, %s1007_s21 }
 0x14d   : > { %p722_p2 = pnand %p721_p1, %p921_p11 }
 0x14e   : > { %p727_p13 = por %p726_p4, %p725_p7 }
 0x14f   : > { %p723_p3 = pneg %p722_p2 }
 0x150   : > { %p729_p8 = por %p728_p6, %p727_p13 }
 0x152   : > { %p730_p12 = pnand %p729_p8, %p723_p3 }
 0x154   : > { %733 = shalt.err (!%p730_p12)
}
 0x155   : > { %s801_s9 = smov 64   ;;  %s802_s18 = smov 4  }
 0x156   : > { %572 = dma.vmem_to_hbm [thread:$0]  (%p921_p11), %s1009_s25, 128, %s1007_s21, %s388_s15, %s801_s9, %s801_s9, %s802_s18  }
 0x157 PF: > { %p589_p10 = scmp.ge.s32.totalorder %s792_s17, 2  ;;  %s419_s8 = sand.u32 1, %s772_s12  }
 0x158   : > { %p1078_p0 = scmp.ne.s32.totalorder %s1068_s23, 0  ;;  %s420_s26 = scalar_lea.sflag [#allocation5], %s419_s8 }
 0x15a   : > { %p583_p5 = pnand %p589_p10, %p1078_p0 }
 0x15c   : > { %767 = dma.done.wait (!%p583_p5), %s420_s26, 128  }
 0x15d   : > { %769 = vsyncadd (!%p583_p5), %s420_s26, 4294967168  ;;  %s20_s17 = sadd.s32 1, %s792_s17   ;;  %s1079_s12 = smov %s776_s13 }
 0x15e   : > { %p17_p9 = scmp.ge.s32.totalorder %s20_s17, 5   ;;  %s1080_s13 = smov %s780_s14 }
 0x15f   : > { %s1081_s14 = smov %s930_s5  ;;  %s1082_s15 = smov %s788_s16 }
 0x160   : > { %s1083_s16 = smov %s1085_s28  ;;  %19 = sbr.rel (!%p17_p9) target bundleno = 7 (0x7), region = 94 }
 0x167   :  { %425 = vsyncpa [#allocation4], 1 }
 0x168   :  { %427 = vsyncpa [#allocation4 + $0x1], 1 }
 0x169   :  { %428 = vsyncpa [#allocation7], 1 }
 0x16a   :  { %430 = vsyncpa [#allocation7 + $0x1], 1 }
 0x16b   :  { %431 = vsyncpa [#allocation5], 1 }
 0x16c   :  { %433 = vsyncpa [#allocation5 + $0x1], 1 }

</bundles_post_ra>
